<compile_context>
chip_gen: v6e
topology: v6e:2x2x1
jax: 0.10.0
libtpu: 0.0.40
codegen_flags: <defaults>
</compile_context>

<pallas_src>
import functools

import jax
import jax.numpy as jnp
from jax.experimental import pallas as pl
from jax.experimental.pallas import tpu as pltpu

_LANE = 128
_MAX_TILE_LANES = 2048          # cap on spatial-tile width (lanes)
_MAX_BLOCK_BYTES = 4 << 20      # per x/out block (Pallas double-buffers them)
_SMALL_C_LIMIT = 64             # below this, do the 1x1 convs on the VPU (exact f32)


def _gam_spatial_kernel(ca_ref, x_ref, w3_ref, b3_ref, w4t_ref, b4_ref, o_ref,
                        *, use_mxu):
    """One (batch, spatial-tile) step.

    ca_ref : (C, 1)   f32   precomputed channel-attention scale
    x_ref  : (C, T)         input tile (io dtype)
    w3_ref : (Cr, C)  [mxu path]  or  (Cr, C, 1)  [vpu path]
    b3_ref : (Cr, 1)
    w4t_ref: (Cr, 1)        transposed second 1x1-conv weight
    b4_ref : (1, 1)
    o_ref  : (C, T)         output tile (io dtype)
    """
    # Channel attention applied per pixel (f32 math).
    x1 = x_ref[...].astype(jnp.float32) * ca_ref[...]                 # (C, T)

    # Spatial attention: 1x1 convs are channel contractions on the tile.
    if use_mxu:
        # TODO(synk): large-C path (MXU); untested at the small test shapes.
        s = jnp.dot(w3_ref[...], x1, preferred_element_type=jnp.float32)
    else:
        # Exact f32 on VPU/XLU: (Cr, C, 1) * (1, C, T) summed over C.
        s = jnp.sum(w3_ref[...] * x1[None, :, :], axis=1)              # (Cr, T)
    s = jnp.maximum(s + b3_ref[...], 0.0)                              # (Cr, T)

    sa_logit = jnp.sum(w4t_ref[...] * s, axis=0, keepdims=True) + b4_ref[...]
    sa = jax.nn.sigmoid(sa_logit)                                      # (1, T), exp -> EUP

    o_ref[...] = (x1 * sa).astype(o_ref.dtype)


def _channel_attention(x_flat_f32, p):
    """Tiny MLP on the global average pool; plain XLA (a few KFLOPs)."""
    avg = jnp.mean(x_flat_f32, axis=2)                                 # (B, C)
    h = jax.nn.relu(avg @ p["w1"].T + p["b1"][:, 0])                   # (B, Cr)
    return jax.nn.sigmoid(h @ p["w2"].T + p["b2"][:, 0])               # (B, C)


def _pick_tile(hw_pad, c, itemsize):
    """Largest 128-multiple dividing hw_pad that keeps blocks under budget."""
    cap = max(_LANE, min(_MAX_TILE_LANES,
                         (_MAX_BLOCK_BYTES // max(1, c * itemsize)) // _LANE * _LANE))
    m = hw_pad // _LANE
    for d in range(min(cap // _LANE, m), 0, -1):
        if m % d == 0:
            return d * _LANE
    return _LANE


def gam_forward(x_nchw, params, io_dtype=jnp.float32):
    """x_nchw: (B, C, H, W). params: dict of weights/biases (see init_params)."""
    B, C, H, W = x_nchw.shape
    HW = H * W
    use_mxu = C > _SMALL_C_LIMIT

    x_flat = x_nchw.reshape(B, C, HW).astype(jnp.float32)

    # ---- channel attention: tiny MLP on the spatial mean, plain XLA ----
    ca = _channel_attention(x_flat, params)[:, :, None]                # (B, C, 1) f32

    # ---- pad spatial axis to a lane multiple (lane-dense tiles & stores) ----
    hw_pad = pl.cdiv(HW, _LANE) * _LANE
    if hw_pad != HW:
        x_flat = jnp.pad(x_flat, ((0, 0), (0, 0), (0, hw_pad - HW)))
    itemsize = jnp.dtype(io_dtype).itemsize
    t_hw = _pick_tile(hw_pad, C, itemsize)
    n_s = hw_pad // t_hw

    x_in = x_flat.astype(io_dtype)

    w3 = params["w3"].astype(jnp.float32)                              # (Cr, C)
    if not use_mxu:
        w3 = w3[:, :, None]                                            # (Cr, C, 1)
    b3 = params["b3"].astype(jnp.float32)                              # (Cr, 1)
    w4t = params["w4"].astype(jnp.float32).T                           # (Cr, 1)
    b4 = params["b4"].astype(jnp.float32)                              # (1, 1)

    def const_spec(shape):
        # Whole array, same block every step => DMA'd once, kept in VMEM.
        return pl.BlockSpec(shape, lambda b, s: (0,) * len(shape))

    # VMEM budget: double-buffered x-in + out tiles plus small weights/slack.
    blk_bytes = C * t_hw * itemsize
    vmem_limit = int(min(max(8 * blk_bytes + (1 << 22), 32 << 20), 60 << 20))

    out = pl.pallas_call(
        functools.partial(_gam_spatial_kernel, use_mxu=use_mxu),
        out_shape=jax.ShapeDtypeStruct((B, C, hw_pad), io_dtype),
        grid_spec=pltpu.PrefetchScalarGridSpec(
            num_scalar_prefetch=0,
            grid=(B, n_s),
            in_specs=[
                # None == squeezed batch dim: kernel sees 2-D (C, ...) refs.
                pl.BlockSpec((None, C, 1), lambda b, s: (b, 0, 0)),     # ca
                pl.BlockSpec((None, C, t_hw), lambda b, s: (b, 0, s)),  # x
                const_spec(tuple(w3.shape)),                            # w3
                const_spec(tuple(b3.shape)),                            # b3
                const_spec(tuple(w4t.shape)),                           # w4^T
                const_spec(tuple(b4.shape)),                            # b4
            ],
            out_specs=pl.BlockSpec((None, C, t_hw), lambda b, s: (b, 0, s)),
        ),
        compiler_params=pltpu.CompilerParams(
            dimension_semantics=("parallel", "parallel"),
            vmem_limit_bytes=vmem_limit),
    )(ca, x_in, w3, b3, w4t, b4)

    if hw_pad != HW:
        out = out[:, :, :HW]
    return out.reshape(B, C, H, W).astype(x_nchw.dtype)


def gam_reference(x, p):
    """Pure-JAX reference of the PyTorch forward (NCHW), exact f32 math."""
    B, C, H, W = x.shape
    xf = x.reshape(B, C, H * W).astype(jnp.float32)
    ca = _channel_attention(xf, p)                                     # (B, C)
    x1 = xf * ca[:, :, None]                                           # (B, C, P)
    s = jax.nn.relu(
        jnp.sum(p["w3"][None, :, :, None] * x1[:, None, :, :], axis=2)
        + p["b3"][None])                                               # (B, Cr, P)
    sa = jax.nn.sigmoid(
        jnp.sum(p["w4"][None, :, :, None] * s[:, None, :, :], axis=2)
        + p["b4"][None])                                               # (B, 1, P)
    return (x1 * sa).reshape(B, C, H, W).astype(x.dtype)


def init_params(key, C, reduction_ratio=4):
    Cr = C // reduction_ratio
    ks = jax.random.split(key, 8)
    scale = 0.5
    return {
        # Conv2d(*, *, 1) weights (out, in, 1, 1) stored as (out, in); biases as columns.
        "w1": scale * jax.random.normal(ks[0], (Cr, C), jnp.float32),
        "b1": scale * jax.random.normal(ks[1], (Cr, 1), jnp.float32),
        "w2": scale * jax.random.normal(ks[2], (C, Cr), jnp.float32),
        "b2": scale * jax.random.normal(ks[3], (C, 1), jnp.float32),
        "w3": scale * jax.random.normal(ks[4], (Cr, C), jnp.float32),
        "b3": scale * jax.random.normal(ks[5], (Cr, 1), jnp.float32),
        "w4": scale * jax.random.normal(ks[6], (1, Cr), jnp.float32),
        "b4": scale * jax.random.normal(ks[7], (1, 1), jnp.float32),
    }


if __name__ == "__main__":
    key = jax.random.PRNGKey(0)
    kx, kp = jax.random.split(key)

    B, C, H, W = 2, 8, 16, 16          # in_channels=8, reduction_ratio=4 -> hidden=2
    x = jax.random.normal(kx, (B, C, H, W), jnp.float32)
    params = init_params(kp, C, reduction_ratio=4)

    out = gam_forward(x, params)
    out = jax.block_until_ready(out)

    ref = gam_reference(x, params)
    assert out.shape == (B, C, H, W)
    assert jnp.allclose(out, ref, atol=1e-5, rtol=1e-5), \
        f"max err {jnp.max(jnp.abs(out - ref))}"

    print("KERNEL_OK")
</pallas_src>

<mosaic_0001>
module attributes {stable_mosaic.version = 11 : i64} {
  func.func @_gam_spatial_kernel(%arg0: i32, %arg1: i32, %arg2: memref<1x8x1xf32, #tpu.memory_space<vmem>>, %arg3: memref<1x8x256xf32, #tpu.memory_space<vmem>>, %arg4: memref<2x8x1xf32, #tpu.memory_space<vmem>>, %arg5: memref<2x1xf32, #tpu.memory_space<vmem>>, %arg6: memref<2x1xf32, #tpu.memory_space<vmem>>, %arg7: memref<1x1xf32, #tpu.memory_space<vmem>>, %arg8: memref<1x8x256xf32, #tpu.memory_space<vmem>>) attributes {dimension_semantics = [#tpu.dimension_semantics<parallel>, #tpu.dimension_semantics<parallel>], iteration_bounds = array<i64: 2, 1>, scalar_prefetch = 0 : i64, scratch_operands = 0 : i64, tpu.core_type = #tpu.core_type<tc>, window_params = [{transform_indices = @transform_0, window_bounds = array<i64: 1, 8, 1>}, {transform_indices = @transform_1, window_bounds = array<i64: 1, 8, 256>}, {pipeline_mode = #tpu.pipeline_mode<synchronous>, transform_indices = @transform_2, window_bounds = array<i64: 2, 8, 1>}, {pipeline_mode = #tpu.pipeline_mode<synchronous>, transform_indices = @transform_3, window_bounds = array<i64: 2, 1>}, {pipeline_mode = #tpu.pipeline_mode<synchronous>, transform_indices = @transform_4, window_bounds = array<i64: 2, 1>}, {pipeline_mode = #tpu.pipeline_mode<synchronous>, transform_indices = @transform_5, window_bounds = array<i64: 1, 1>}, {transform_indices = @transform_6, window_bounds = array<i64: 1, 8, 256>}]} {
    %c0 = arith.constant 0 : index
    %c0_0 = arith.constant 0 : index
    %c0_1 = arith.constant 0 : index
    %0 = vector.load %arg3[%c0, %c0_0, %c0_1] : memref<1x8x256xf32, #tpu.memory_space<vmem>>, vector<1x8x256xf32>
    %1 = vector.shape_cast %0 : vector<1x8x256xf32> to vector<8x256xf32>
    %c0_2 = arith.constant 0 : index
    %c0_3 = arith.constant 0 : index
    %c0_4 = arith.constant 0 : index
    %2 = vector.load %arg2[%c0_2, %c0_3, %c0_4] : memref<1x8x1xf32, #tpu.memory_space<vmem>>, vector<1x8x1xf32>
    %3 = vector.shape_cast %2 : vector<1x8x1xf32> to vector<8x1xf32>
    %4 = vector.broadcast %3 : vector<8x1xf32> to vector<8x256xf32>
    %5 = arith.mulf %1, %4 : vector<8x256xf32>
    %c0_5 = arith.constant 0 : index
    %c0_6 = arith.constant 0 : index
    %c0_7 = arith.constant 0 : index
    %6 = vector.load %arg4[%c0_5, %c0_6, %c0_7] : memref<2x8x1xf32, #tpu.memory_space<vmem>>, vector<2x8x1xf32>
    %7 = vector.shape_cast %5 : vector<8x256xf32> to vector<1x8x256xf32>
    %8 = vector.broadcast %6 : vector<2x8x1xf32> to vector<2x8x256xf32>
    %9 = vector.broadcast %7 : vector<1x8x256xf32> to vector<2x8x256xf32>
    %10 = arith.mulf %8, %9 : vector<2x8x256xf32>
    %cst = arith.constant dense<0.000000e+00> : vector<2x256xf32>
    %11 = vector.multi_reduction <add>, %10, %cst [1] : vector<2x8x256xf32> to vector<2x256xf32>
    %c0_8 = arith.constant 0 : index
    %c0_9 = arith.constant 0 : index
    %12 = vector.load %arg5[%c0_8, %c0_9] : memref<2x1xf32, #tpu.memory_space<vmem>>, vector<2x1xf32>
    %13 = vector.broadcast %12 : vector<2x1xf32> to vector<2x256xf32>
    %14 = arith.addf %11, %13 : vector<2x256xf32>
    %cst_10 = arith.constant 0.000000e+00 : f32
    %15 = vector.broadcast %cst_10 : f32 to vector<2x256xf32>
    %16 = arith.maximumf %14, %15 : vector<2x256xf32>
    %c0_11 = arith.constant 0 : index
    %c0_12 = arith.constant 0 : index
    %17 = vector.load %arg6[%c0_11, %c0_12] : memref<2x1xf32, #tpu.memory_space<vmem>>, vector<2x1xf32>
    %18 = vector.broadcast %17 : vector<2x1xf32> to vector<2x256xf32>
    %19 = arith.mulf %18, %16 : vector<2x256xf32>
    %cst_13 = arith.constant dense<0.000000e+00> : vector<256xf32>
    %20 = vector.multi_reduction <add>, %19, %cst_13 [0] : vector<2x256xf32> to vector<256xf32>
    %21 = vector.shape_cast %20 : vector<256xf32> to vector<1x256xf32>
    %c0_14 = arith.constant 0 : index
    %c0_15 = arith.constant 0 : index
    %22 = vector.load %arg7[%c0_14, %c0_15] : memref<1x1xf32, #tpu.memory_space<vmem>>, vector<1x1xf32>
    %23 = vector.broadcast %22 : vector<1x1xf32> to vector<1x256xf32>
    %24 = arith.addf %21, %23 : vector<1x256xf32>
    %25 = arith.negf %24 : vector<1x256xf32>
    %26 = math.exp %25 : vector<1x256xf32>
    %cst_16 = arith.constant 1.000000e+00 : f32
    %27 = vector.broadcast %cst_16 : f32 to vector<1x256xf32>
    %28 = arith.addf %27, %26 : vector<1x256xf32>
    %29 = arith.divf %27, %28 : vector<1x256xf32>
    %30 = vector.broadcast %29 : vector<1x256xf32> to vector<8x256xf32>
    %31 = arith.mulf %5, %30 : vector<8x256xf32>
    %c0_17 = arith.constant 0 : index
    %c0_18 = arith.constant 0 : index
    %c0_19 = arith.constant 0 : index
    %32 = vector.load %arg8[%c0_17, %c0_18, %c0_19] : memref<1x8x256xf32, #tpu.memory_space<vmem>>, vector<1x8x256xf32>
    %33 = vector.shape_cast %32 : vector<1x8x256xf32> to vector<8x256xf32>
    %34 = vector.shape_cast %31 : vector<8x256xf32> to vector<1x8x256xf32>
    tpu.vector_store %arg8[%c0_17, %c0_18, %c0_19], %34 {strides = array<i32>} : memref<1x8x256xf32, #tpu.memory_space<vmem>>, vector<1x8x256xf32>,
    return
  }
  func.func @transform_0(%arg0: i32, %arg1: i32) -> (i32, i32, i32) {
    %c0_i32 = arith.constant 0 : i32
    %c0_i32_0 = arith.constant 0 : i32
    %c0_i32_1 = arith.constant 0 : i32
    return %arg0, %c0_i32, %c0_i32_0 : i32, i32, i32
  }
  func.func @transform_1(%arg0: i32, %arg1: i32) -> (i32, i32, i32) {
    %c0_i32 = arith.constant 0 : i32
    %c0_i32_0 = arith.constant 0 : i32
    return %arg0, %c0_i32, %arg1 : i32, i32, i32
  }
  func.func @transform_2(%arg0: i32, %arg1: i32) -> (i32, i32, i32) {
    %c0_i32 = arith.constant 0 : i32
    %c0_i32_0 = arith.constant 0 : i32
    %c0_i32_1 = arith.constant 0 : i32
    %c0_i32_2 = arith.constant 0 : i32
    return %c0_i32, %c0_i32_0, %c0_i32_1 : i32, i32, i32
  }
  func.func @transform_3(%arg0: i32, %arg1: i32) -> (i32, i32) {
    %c0_i32 = arith.constant 0 : i32
    %c0_i32_0 = arith.constant 0 : i32
    %c0_i32_1 = arith.constant 0 : i32
    return %c0_i32, %c0_i32_0 : i32, i32
  }
  func.func @transform_4(%arg0: i32, %arg1: i32) -> (i32, i32) {
    %c0_i32 = arith.constant 0 : i32
    %c0_i32_0 = arith.constant 0 : i32
    %c0_i32_1 = arith.constant 0 : i32
    return %c0_i32, %c0_i32_0 : i32, i32
  }
  func.func @transform_5(%arg0: i32, %arg1: i32) -> (i32, i32) {
    %c0_i32 = arith.constant 0 : i32
    %c0_i32_0 = arith.constant 0 : i32
    %c0_i32_1 = arith.constant 0 : i32
    return %c0_i32, %c0_i32_0 : i32, i32
  }
  func.func @transform_6(%arg0: i32, %arg1: i32) -> (i32, i32, i32) {
    %c0_i32 = arith.constant 0 : i32
    %c0_i32_0 = arith.constant 0 : i32
    return %arg0, %c0_i32, %arg1 : i32, i32, i32
  }
}

</mosaic_0001>

<bundles_post_ra>
// kernel: tpu_custom_call.1
= control target key start
LH: loop header
LB: loop body
LE: loop exit
PB: predicated region body
PF: predicated region fallthrough
CT: control target
= control target key end

     0   :  { %s865_s0 = inlined_call_operand.vmem [shape: f32[2,8,1], index: 0, kind: input, shape index: {}]   ;;  %s866_s1 = inlined_call_operand.vmem [shape: f32[2,8,256], index: 1, kind: input, shape index: {}]   ;;  %s867_s2 = inlined_call_operand.vmem [shape: f32[2,8,1], index: 2, kind: input, shape index: {}]   ;;  %s868_s3 = inlined_call_operand.vmem [shape: f32[2,1], index: 3, kind: input, shape index: {}]   ;;  %s869_s4 = inlined_call_operand.vmem [shape: f32[2,1], index: 4, kind: input, shape index: {}]   ;;  %s870_s5 = inlined_call_operand.<no memory space> [shape: f32[1,1], index: 5, kind: input, shape index: {}]   ;;  %s871_s6 = inlined_call_operand.hbm [shape: f32[2,8,256], index: 6, kind: output, shape index: {}]  }
   0x1   :  { %v11_v0 = vstv %s870_s5 }
   0x2   :  { %12 = vst [vmem:[#allocation2] sm:$0x1] %v11_v0 }
   0x3   :  { %13 = vsyncpa [#allocation4], 0 }
   0x4   :  { %15 = vsyncpa [#allocation4 + $0x1], 0  ;;  %s735_s23 = smov 0   ;;  %s737_s24 = smov 0  }
   0x5   :  { %s739_s25 = smov 0   ;;  %s741_s26 = smov 0  }
   0x6   :  { %s743_s27 = smov 0   ;;  %s745_s28 = smov 0  }
   0x7 LB: > { %s533_s5 = sadd.s32 4294967295, %s693_s28   ;;  %s534_s29 = sadd.s32 4294967294, %s693_s28   ;;  %s693_s28 = sphi %s745_s28, %s21_s28   ;;  %s689_s27 = sphi %s743_s27, %s878_s27   ;;  %s685_s26 = sphi %s741_s26, %s877_s26   ;;  %s681_s25 = sphi %s739_s25, %s876_s25   ;;  %s677_s24 = sphi %s737_s24, %s875_s24   ;;  %s673_s23 = sphi %s735_s23, %s874_s23  }
   0x8   : > { %s33_s30 = sadd.s32 1, %s689_s27  ;;  %s180_s7 = sadd.s32 1, %s681_s25 }
   0x9   : > { %p35_p0 = scmp.ge.s32.totalorder %s33_s30, 2  ;;  %p190_p1 = scmp.ne.s32.totalorder %s681_s25, %s677_s24 }
   0xa   : > { %p191_p2 = scmp.eq.s32.totalorder %s533_s5, 1  ;;  %p196_p3 = scmp.ne.s32.totalorder %s677_s24, %s673_s23 }
   0xb   : > { %s880_s30 = smov (%p35_p0, %s33_s30), 0  ;;  %p197_p5 = scmp.eq.s32.totalorder %s534_s29, 1 }
   0xc   : > { %p775_p4 = por %p191_p2, %p190_p1  ;;  %s175_s9 = ssub.s32 %s689_s27, %s880_s30 }
   0xd   : > { %p537_p6 = scmp.ge.s32.totalorder %s693_s28, 1  ;;  %p178_p7 = scmp.eq.s32.totalorder %s175_s9, 0 }
   0xe   : > { %p782_p8 = por %p197_p5, %p196_p3  ;;  %p247_p9 = scmp.lt.s32.totalorder %s693_s28, 3 }
   0xf   : > { %s788_s11 = scalar_select %p178_p7, %s681_s25, %s180_s7  }
  0x10   : > { %p248_p10 = pnand %p537_p6, %p247_p9 }
  0x11   : > { %p285_p11 = scmp.lt.s32.totalorder (!%p248_p10), %s685_s26, 1  ;;  %s550_s16 = sshll.u32 (!%p248_p10), %s685_s26, 8 }
  0x12   : > { %251 = sbr.rel (%p248_p10) target bundleno = 242 (0xf2), region = 44  ;;  %s825_s21 = scalar_lea.hbm (!%p248_p10), %s871_s6, %s550_s16 }
  0x17   : > { %v310_v1 = vld [vmem:[%s867_s2] sm:$0xff]  ;;  %v695_v2 = vmov 0   ;;  %s286_s14 = scalar_select %p285_p11, %s685_s26, 1  ;;  %v311_v6 = vld [vmem:[%s867_s2 + $0x8] sm:$0xff]  ;;  %vm377_vm0 = vcmask 1041409   ;;  %vm385_vm1 = vcmask 1041408   ;;  %v406_v60 = vlaneseq }
  0x18   : > { %608 = vset.pattern.permute.xlu1 %v695_v2  ;;  %607 = vset.pattern.permute.xlu0 %v695_v2  ;;  %v350_v3 = vld [vmem:[%s868_s3] sm:$0x3]  ;;  %s696_s26 = smov [#allocation3]  }
  0x19   : > { %314 = vperm.xlu1 %608, %v310_v1   ;;  %s539_s17 = sshll.u32 %s286_s14, 3  ;;  %v400_v5 = vld [vmem:[#allocation2] sm:$0x1]  ;;  %s549_s7 = sshll.u32 %s286_s14, 4  ;;  %v407_v1 = vshrl.u32 %v406_v60, 7 }
  0x1a   : > { %s288_s20 = scalar_lea.vmem %s865_s0, %s539_s17  ;;  %v366_v7 = vld [vmem:[%s869_s4] sm:$0x3]  ;;  %s297_s13 = scalar_lea.vmem %s866_s1, %s549_s7 }
  0x1b   : > { %v302_v4 = vld [vmem:[%s288_s20] sm:$0xff]  ;;  %v301_v9 = vld [vmem:[%s297_s13 + $0x8] sm:$0xff]  ;;  %s282_s14 = sand.u32 1, %s677_s24   ;;  %s621_s29 = sshll.u32 %s696_s26, 4  ;;  %s622_s29 = int_to_ptr.vmem [resolvable:$false] %s621_s29 }
  0x1c   : > { %305 = vperm.xlu0 %607, %v302_v4   ;;  %v300_v8 = vld [vmem:[%s297_s13] sm:$0xff]  ;;  %s538_s15 = sshll.u32 %s282_s14, 4  ;;  %s429_s22 = scalar_lea.sflag [#allocation4], %s282_s14 }
  0x1d   : > { %353 = vperm.xlu1 %608, %v350_v3   ;;  %s284_s17 = scalar_lea.vmem [#allocation3], %s538_s15  ;;  %s623_s7 = scalar_lea.vmem %s622_s29, 512 }
  0x1e   : > { %s445_s18 = sshll.u32 %s284_s17, 4  ;;  %s446_s18 = int_to_ptr.vmem [resolvable:$true] %s445_s18 }
  0x1f   : > { %s617_s5 = scalar_lea.vmem %s446_s18, 256  ;;  %p624_p1 = scmp.lt.s32.totalorder %s446_s18, %s622_s29 }
  0x20   : > { %319 = vperm.xlu0 %607, %v311_v6   ;;  %v408_v6 = vsub.s32 0, %v407_v1  ;;  %p618_p12 = scmp.ne.s32.totalorder %s446_s18, %s617_s5  ;;  %p625_p2 = scmp.lt.s32.totalorder %s623_s7, %s617_s5 }
  0x21   : > { %403 = vperm.xlu1 %608, %v400_v5  }
  0x22   : > { %p619_p13 = pnand %p618_p12, %p775_p4  ;;  %p626_p3 = por %p625_p2, %p624_p1 }
  0x24   : > { %369 = vperm.xlu0 %607, %v366_v7   ;;  %p620_p0 = pneg %p619_p13 }
  0x26   : > { %p627_p5 = pnand %p626_p3, %p620_p0 }
  0x94   : > { %v315_v13 = vpop.permute.xlu1 %314 }
  0x97   : > { %v306_v10 = vpop.permute.xlu0 %305 }
  0x98   : > { %v810_v11 = vmul.f32 %v306_v10, %v300_v8  ;;  %v812_v12 = vmul.f32 %v306_v10, %v301_v9  ;;  %v354_v41 = vpop.permute.xlu1 %353 }
  0x99   : > { %v355_v42 = vrot.slane %v354_v41, 1 }
  0x9a   : > { %v322_v14 = vmul.f32 %v315_v13, %v810_v11  ;;  %v323_v15 = vmul.f32 %v315_v13, %v812_v12 }
  0x9b   : > { %v320_v16 = vpop.permute.xlu0 %319 }
  0x9c   : > { %v326_v17 = vrot.slane %v322_v14, 4  ;;  %v332_v18 = vrot.slane %v323_v15, 4  ;;  %v324_v19 = vmul.f32 %v320_v16, %v810_v11  ;;  %v325_v20 = vmul.f32 %v320_v16, %v812_v12  ;;  %v404_v9 = vpop.permute.xlu1 %403 }
  0x9e   : > { %v327_v21 = vadd.f32 %v326_v17, %v322_v14  ;;  %v333_v22 = vadd.f32 %v332_v18, %v323_v15  ;;  %v338_v23 = vrot.slane %v324_v19, 4  ;;  %v344_v24 = vrot.slane %v325_v20, 4 }
  0x9f   : > { %v370_v57 = vpop.permute.xlu0 %369  ;;  %v409_v14 = vrot.slane %v404_v9, %v408_v6 }
  0xa0   : > { %v328_v25 = vrot.slane %v327_v21, 2  ;;  %v334_v26 = vrot.slane %v333_v22, 2  ;;  %v339_v27 = vadd.f32 %v338_v23, %v324_v19  ;;  %v345_v28 = vadd.f32 %v344_v24, %v325_v20 }
  0xa2   : > { %v329_v29 = vadd.f32 %v328_v25, %v327_v21  ;;  %v335_v30 = vadd.f32 %v334_v26, %v333_v22  ;;  %v340_v31 = vrot.slane %v339_v27, 2  ;;  %v346_v32 = vrot.slane %v345_v28, 2 }
  0xa4   : > { %v330_v33 = vrot.slane %v329_v29, 1  ;;  %v336_v34 = vrot.slane %v335_v30, 1  ;;  %v341_v35 = vadd.f32 %v340_v31, %v339_v27  ;;  %v347_v36 = vadd.f32 %v346_v32, %v345_v28 }
  0xa6   : > { %v331_v37 = vadd.f32 %v330_v33, %v329_v29  ;;  %v337_v38 = vadd.f32 %v336_v34, %v335_v30  ;;  %v342_v39 = vrot.slane %v341_v35, 1  ;;  %v348_v40 = vrot.slane %v347_v36, 1 }
  0xa8   : > { %v343_v43 = vadd.f32 %v342_v39, %v341_v35  ;;  %v349_v44 = vadd.f32 %v348_v40, %v347_v36  ;;  %v358_v45 = vadd.f32 %v354_v41, %v331_v37  ;;  %v359_v46 = vadd.f32 %v354_v41, %v337_v38 }
  0xaa   : > { %v360_v47 = vadd.f32 %v355_v42, %v343_v43  ;;  %v361_v48 = vadd.f32 %v355_v42, %v349_v44  ;;  %v362_v51 = vmax.f32 %v358_v45, 0.0  ;;  %v363_v52 = vmax.f32 %v359_v46, 0.0 }
  0xac   : > { %v364_v49 = vmax.f32 %v360_v47, 0.0  ;;  %v365_v50 = vmax.f32 %v361_v48, 0.0 }
  0xae   : > { %v376_v53 = vrot.slane %v364_v49, 7  ;;  %v379_v54 = vrot.slane %v365_v50, 7 }
  0xb0   : > { %v378_v55 = vsel %vm377_vm0, %v376_v53, %v362_v51  ;;  %v380_v56 = vsel %vm377_vm0, %v379_v54, %v363_v52 }
  0xb1   : > { %v383_v58 = vmul.f32 %v378_v55, %v370_v57  ;;  %v384_v59 = vmul.f32 %v380_v56, %v370_v57 }
  0xb3   : > { %v386_v61 = vsel %vm385_vm1, %v383_v58, 0.0  ;;  %v393_v62 = vsel %vm385_vm1, %v384_v59, 0.0 }
  0xb4   : > { %v387_v63 = vrot.slane %v386_v61, 4  ;;  %v394_v0 = vrot.slane %v393_v62, 4 }
  0xb6   : > { %v388_v2 = vadd.f32 %v387_v63, %v386_v61  ;;  %v395_v3 = vadd.f32 %v394_v0, %v393_v62 }
  0xb8   : > { %v389_v4 = vrot.slane %v388_v2, 2  ;;  %v396_v5 = vrot.slane %v395_v3, 2 }
  0xba   : > { %v390_v7 = vadd.f32 %v389_v4, %v388_v2  ;;  %v397_v8 = vadd.f32 %v396_v5, %v395_v3 }
  0xbc   : > { %v391_v10 = vrot.slane %v390_v7, 1  ;;  %v398_v13 = vrot.slane %v397_v8, 1 }
  0xbe   : > { %v392_v15 = vadd.f32 %v391_v10, %v390_v7  ;;  %v399_v16 = vadd.f32 %v398_v13, %v397_v8 }
  0xc0   : > { %v410_v17 = vadd.f32 %v409_v14, %v392_v15  ;;  %v411_v18 = vadd.f32 %v409_v14, %v399_v16 }
  0xc2   : > { %v542_v19 = vmul.f32 -1.442695, %v410_v17  ;;  %v543_v20 = vmul.f32 -1.442695, %v411_v18 }
  0xc4   : > { %609 = vpow2.f32 %v542_v19 }
  0xc5   : > { %611 = vpow2.f32 %v543_v20 }
  0xd1   : > { %v610_v21 = vpop.eup %609 }
  0xd2   : > { %v612_v22 = vpop.eup %611  ;;  %v418_v23 = vadd.f32 1.0, %v610_v21 }
  0xd3   : > { %v419_v24 = vadd.f32 1.0, %v612_v22 }
  0xd4   : > { %613 = vrcp.f32 %v418_v23 }
  0xd5   : > { %615 = vrcp.f32 %v419_v24 }
  0xe1   : > { %v614_v25 = vpop.eup %613 }
  0xe2   : > { %v616_v26 = vpop.eup %615  ;;  %v424_v27 = vmul.f32 %v614_v25, %v810_v11 }
  0xe3   : > { %v425_v28 = vmul.f32 %v616_v26, %v812_v12 }
  0xe4   : > { %426 = vst [vmem:[%s284_s17] sm:$0xff] %v424_v27 }
  0xe5   : > { %427 = vst [vmem:[%s284_s17 + $0x8] sm:$0xff] %v425_v28 }
  0xe6   : > { %630 = shalt.err (!%p627_p5)
}
  0xe7   : > { %s631_s9 = scalar_lea.hbm %s825_s21, 256  ;;  %s635_s14 = scalar_lea.hbm %s871_s6, 512 }
  0xe8   : > { %p632_p6 = scmp.ne.s32.totalorder %s825_s21, %s631_s9  ;;  %p636_p10 = scmp.lt.s32.totalorder %s825_s21, %s871_s6 }
  0xe9   : > { %p637_p11 = scmp.lt.s32.totalorder %s635_s14, %s631_s9 }
  0xea   : > { %p633_p7 = pnand %p632_p6, %p775_p4 }
  0xeb   : > { %p638_p12 = por %p637_p11, %p636_p10 }
  0xec   : > { %p634_p9 = pneg %p633_p7 }
  0xee   : > { %p639_p13 = pnand %p638_p12, %p634_p9 }
  0xf0   : > { %642 = shalt.err (!%p639_p13)
}
  0xf1   : > { %551 = dma.vmem_to_hbm [thread:$0]  (%p775_p4), %s446_s18, 256, %s825_s21, %s429_s22  }
  0xf2 PF: > { %p557_p0 = scmp.ge.s32.totalorder %s693_s28, 2  ;;  %s457_s17 = sand.u32 1, %s673_s23  }
  0xf3   : > { %s458_s19 = scalar_lea.sflag [#allocation4], %s457_s17 }
  0xf4   : > { %p554_p1 = pnand %p557_p0, %p782_p8 }
  0xf6   : > { %p555_p2 = pneg %p554_p1 }
  0xf8   : > { %668 = dma.done.wait (%p555_p2), %s458_s19, 256  }
  0xf9   : > { %670 = vsyncadd (%p555_p2), %s458_s19, 4294967040  ;;  %s21_s28 = sadd.s32 1, %s693_s28   ;;  %s874_s23 = smov %s677_s24 }
  0xfa   : > { %p18_p3 = scmp.ge.s32.totalorder %s21_s28, 4   ;;  %s875_s24 = smov %s681_s25 }
  0xfb   : > { %s876_s25 = smov %s788_s11  ;;  %s877_s26 = smov %s689_s27 }
  0xfc   : > { %s878_s27 = smov %s880_s30  ;;  %20 = sbr.rel (!%p18_p3) target bundleno = 7 (0x7), region = 82 }
 0x101   :  { %463 = vsyncpa [#allocation4], 1 }
 0x102   :  { %465 = vsyncpa [#allocation4 + $0x1], 1 }

</bundles_post_ra>
